<compile_context>
chip_gen: v6e
topology: v6e:2x2x1
jax: 0.10.0
libtpu: 0.0.40
codegen_flags: <defaults>
</compile_context>

<pallas_src>
import jax
import jax.numpy as jnp
from jax import lax
from jax.experimental import pallas as pl
from jax.experimental.pallas import tpu as pltpu


_SUB = 2048                      # in-kernel sub-chunk rows (bounds intermediates)
_TB_MAX = 16384                  # max batch-tile rows; multiple of _SUB
_VMEM_LIMIT_BYTES = 48 * 1024 * 1024


def _round_up(n, m):
    return ((n + m - 1) // m) * m


def _mlp_kernel(x_ref, w1t_ref, b1_ref, w2t_ref, b2_ref, o_ref):
    # x_ref: (tb, 22)  w1t_ref: (22, 5)  b1_ref: (1, 5)
    # w2t_ref: (5, 2)  b2_ref: (1, 2)    o_ref:  (tb, 2)
    w1t = w1t_ref[...]
    b1 = b1_ref[...]
    w2t = w2t_ref[...]
    b2 = b2_ref[...]

    def compute(x):
        # Linear 1 (MXU) + bias
        z1 = jnp.dot(x, w1t, preferred_element_type=jnp.float32) + b1
        # Sigmoid -> EUP slot, hidden under DMA
        a1 = jax.nn.sigmoid(z1)
        # Linear 2 (MXU) + bias; no output activation (matches forward()).
        return jnp.dot(a1, w2t, preferred_element_type=jnp.float32) + b2

    tb = x_ref.shape[0]          # static
    if tb <= _SUB:
        # Small / full-array block: single shot.
        o_ref[...] = compute(x_ref[...]).astype(o_ref.dtype)
    else:
        # Large tile: wrapper guarantees tb % _SUB == 0.  Chunk along the
        # sublane (batch) axis so the lane-padded (chunk, 5)/(chunk, 2)
        # intermediates stay ~1 MiB instead of spilling (tb, 5) activations.
        n_sub = tb // _SUB

        def body(s, carry):
            i = pl.multiple_of(s * _SUB, _SUB)
            y = compute(x_ref[pl.ds(i, _SUB), :])
            o_ref[pl.ds(i, _SUB), :] = y.astype(o_ref.dtype)
            return carry

        lax.fori_loop(0, n_sub, body, 0, unroll=True)


def two_layer_classifier(x, w1, b1, w2, b2):
    """Forward pass.

    x:  (B, 22) float32
    w1: (5, 22) float32   (torch-style: out_features x in_features)
    b1: (5,)    float32
    w2: (2, 5)  float32
    b2: (2,)    float32
    Returns (B, 2) float32 logits.
    """
    B, F_in = x.shape
    H, _ = w1.shape
    C, _ = w2.shape

    # Only the tiny weights get re-laid-out (O(1) bytes); x and the output
    # keep their natural (B, features) HBM layout -> no extra HBM passes.
    w1t = w1.T                     # (22, 5)
    w2t = w2.T                     # (5, 2)
    b1r = b1.reshape(1, H)         # (1, 5)
    b2r = b2.reshape(1, C)         # (1, 2)

    # Batch tile: full array for tiny batches (block == full dim is legal for
    # any B); otherwise target >=4 grid steps (v7x megacore sharding) with
    # _SUB-aligned tiles capped at _TB_MAX (VMEM budget, see header).
    if B <= _SUB:
        tb = B
    else:
        tb = min(_TB_MAX, _round_up(pl.cdiv(B, 4), _SUB))
    grid = (pl.cdiv(B, tb),)

    cost = pl.CostEstimate(
        flops=2 * B * (F_in * H + H * C),
        transcendentals=B * H,
        bytes_accessed=4 * (B * (F_in + C) + F_in * H + H + H * C + C),
    )

    out = pl.pallas_call(
        _mlp_kernel,
        out_shape=jax.ShapeDtypeStruct((B, C), jnp.float32),
        grid=grid,
        in_specs=[
            pl.BlockSpec((tb, F_in), lambda i: (i, 0)),   # x tile, pipelined
            pl.BlockSpec((F_in, H), lambda i: (0, 0)),    # w1.T, VMEM-resident
            pl.BlockSpec((1, H), lambda i: (0, 0)),       # b1
            pl.BlockSpec((H, C), lambda i: (0, 0)),       # w2.T
            pl.BlockSpec((1, C), lambda i: (0, 0)),       # b2
        ],
        out_specs=pl.BlockSpec((tb, C), lambda i: (i, 0)),
        compiler_params=pltpu.CompilerParams(
            dimension_semantics=("parallel",),
            vmem_limit_bytes=_VMEM_LIMIT_BYTES,
        ),
        cost_estimate=cost,
    )(x, w1t, b1r, w2t, b2r)

    return out


def init_params(key, input_features=22, hidden=5, output_classes=2):
    """torch.nn.Linear-style (uniform +/- 1/sqrt(fan_in)) init, torch layout."""
    k1, k2, k3, k4 = jax.random.split(key, 4)
    bound1 = 1.0 / (input_features ** 0.5)
    bound2 = 1.0 / (hidden ** 0.5)
    w1 = jax.random.uniform(k1, (hidden, input_features), jnp.float32, -bound1, bound1)
    b1 = jax.random.uniform(k2, (hidden,), jnp.float32, -bound1, bound1)
    w2 = jax.random.uniform(k3, (output_classes, hidden), jnp.float32, -bound2, bound2)
    b2 = jax.random.uniform(k4, (output_classes,), jnp.float32, -bound2, bound2)
    return w1, b1, w2, b2


def _reference(x, w1, b1, w2, b2):
    z1 = x @ w1.T + b1
    a1 = jax.nn.sigmoid(z1)
    return a1 @ w2.T + b2


if __name__ == "__main__":
    key = jax.random.PRNGKey(0)
    k_params, k_x, k_x2 = jax.random.split(key, 3)

    input_features = 22
    output_classes = 2
    w1, b1, w2, b2 = init_params(k_params, input_features, 5, output_classes)

    # Small-batch case (single block, block_shape == full array).
    batch = 8
    x = jax.random.normal(k_x, (batch, input_features), jnp.float32)
    y = jax.block_until_ready(two_layer_classifier(x, w1, b1, w2, b2))
    y_ref = _reference(x, w1, b1, w2, b2)
    assert y.shape == (batch, output_classes)
    assert jnp.allclose(y, y_ref, atol=1e-5, rtol=1e-5)

    # Larger batch exercising the batch grid + partial last tile
    # (tb = 2048 -> grid = 3, last block has 904 valid rows).
    batch2 = 5000
    x2 = jax.random.normal(k_x2, (batch2, input_features), jnp.float32)
    y2 = jax.block_until_ready(two_layer_classifier(x2, w1, b1, w2, b2))
    y2_ref = _reference(x2, w1, b1, w2, b2)
    assert y2.shape == (batch2, output_classes)
    assert jnp.allclose(y2, y2_ref, atol=1e-5, rtol=1e-5)

    print("KERNEL_OK")
</pallas_src>

<mosaic_0001>
module attributes {stable_mosaic.version = 11 : i64} {
  func.func @_mlp_kernel(%arg0: i32, %arg1: memref<8x22xf32, #tpu.memory_space<vmem>>, %arg2: memref<22x5xf32, #tpu.memory_space<vmem>>, %arg3: memref<1x5xf32, #tpu.memory_space<vmem>>, %arg4: memref<5x2xf32, #tpu.memory_space<vmem>>, %arg5: memref<1x2xf32, #tpu.memory_space<vmem>>, %arg6: memref<8x2xf32, #tpu.memory_space<vmem>>) attributes {dimension_semantics = [#tpu.dimension_semantics<parallel>], iteration_bounds = array<i64: 1>, scalar_prefetch = 0 : i64, scratch_operands = 0 : i64, tpu.core_type = #tpu.core_type<tc>, window_params = [{transform_indices = @transform_0, window_bounds = array<i64: 8, 22>}, {pipeline_mode = #tpu.pipeline_mode<synchronous>, transform_indices = @transform_1, window_bounds = array<i64: 22, 5>}, {pipeline_mode = #tpu.pipeline_mode<synchronous>, transform_indices = @transform_2, window_bounds = array<i64: 1, 5>}, {pipeline_mode = #tpu.pipeline_mode<synchronous>, transform_indices = @transform_3, window_bounds = array<i64: 5, 2>}, {pipeline_mode = #tpu.pipeline_mode<synchronous>, transform_indices = @transform_4, window_bounds = array<i64: 1, 2>}, {transform_indices = @transform_5, window_bounds = array<i64: 8, 2>}]} {
    %c0 = arith.constant 0 : index
    %c0_0 = arith.constant 0 : index
    %0 = vector.load %arg2[%c0, %c0_0] : memref<22x5xf32, #tpu.memory_space<vmem>>, vector<22x5xf32>
    %c0_1 = arith.constant 0 : index
    %c0_2 = arith.constant 0 : index
    %1 = vector.load %arg3[%c0_1, %c0_2] : memref<1x5xf32, #tpu.memory_space<vmem>>, vector<1x5xf32>
    %c0_3 = arith.constant 0 : index
    %c0_4 = arith.constant 0 : index
    %2 = vector.load %arg4[%c0_3, %c0_4] : memref<5x2xf32, #tpu.memory_space<vmem>>, vector<5x2xf32>
    %c0_5 = arith.constant 0 : index
    %c0_6 = arith.constant 0 : index
    %3 = vector.load %arg5[%c0_5, %c0_6] : memref<1x2xf32, #tpu.memory_space<vmem>>, vector<1x2xf32>
    %c0_7 = arith.constant 0 : index
    %c0_8 = arith.constant 0 : index
    %4 = vector.load %arg1[%c0_7, %c0_8] : memref<8x22xf32, #tpu.memory_space<vmem>>, vector<8x22xf32>
    %cst = arith.constant dense<0.000000e+00> : vector<8x5xf32>
    %5 = tpu.matmul %4, %0, %cst {dimension_numbers = #tpu.dot_dimension_numbers<[1], [0], [0], [1], [0, 0, 1, 1], [], []>} : vector<8x22xf32>, vector<22x5xf32>, vector<8x5xf32> -> vector<8x5xf32>
    %6 = vector.broadcast %1 : vector<1x5xf32> to vector<8x5xf32>
    %7 = arith.addf %5, %6 : vector<8x5xf32>
    %8 = arith.negf %7 : vector<8x5xf32>
    %9 = math.exp %8 : vector<8x5xf32>
    %cst_9 = arith.constant 1.000000e+00 : f32
    %10 = vector.broadcast %cst_9 : f32 to vector<8x5xf32>
    %11 = arith.addf %10, %9 : vector<8x5xf32>
    %12 = arith.divf %10, %11 : vector<8x5xf32>
    %cst_10 = arith.constant dense<0.000000e+00> : vector<8x2xf32>
    %13 = tpu.matmul %12, %2, %cst_10 {dimension_numbers = #tpu.dot_dimension_numbers<[1], [0], [0], [1], [0, 0, 1, 1], [], []>} : vector<8x5xf32>, vector<5x2xf32>, vector<8x2xf32> -> vector<8x2xf32>
    %14 = vector.broadcast %3 : vector<1x2xf32> to vector<8x2xf32>
    %15 = arith.addf %13, %14 : vector<8x2xf32>
    %c0_11 = arith.constant 0 : index
    %c0_12 = arith.constant 0 : index
    %16 = vector.load %arg6[%c0_11, %c0_12] : memref<8x2xf32, #tpu.memory_space<vmem>>, vector<8x2xf32>
    tpu.vector_store %arg6[%c0_11, %c0_12], %15 {strides = array<i32>} : memref<8x2xf32, #tpu.memory_space<vmem>>, vector<8x2xf32>,
    return
  }
  func.func @transform_0(%arg0: i32) -> (i32, i32) {
    %c0_i32 = arith.constant 0 : i32
    %c0_i32_0 = arith.constant 0 : i32
    return %arg0, %c0_i32 : i32, i32
  }
  func.func @transform_1(%arg0: i32) -> (i32, i32) {
    %c0_i32 = arith.constant 0 : i32
    %c0_i32_0 = arith.constant 0 : i32
    %c0_i32_1 = arith.constant 0 : i32
    return %c0_i32, %c0_i32_0 : i32, i32
  }
  func.func @transform_2(%arg0: i32) -> (i32, i32) {
    %c0_i32 = arith.constant 0 : i32
    %c0_i32_0 = arith.constant 0 : i32
    %c0_i32_1 = arith.constant 0 : i32
    return %c0_i32, %c0_i32_0 : i32, i32
  }
  func.func @transform_3(%arg0: i32) -> (i32, i32) {
    %c0_i32 = arith.constant 0 : i32
    %c0_i32_0 = arith.constant 0 : i32
    %c0_i32_1 = arith.constant 0 : i32
    return %c0_i32, %c0_i32_0 : i32, i32
  }
  func.func @transform_4(%arg0: i32) -> (i32, i32) {
    %c0_i32 = arith.constant 0 : i32
    %c0_i32_0 = arith.constant 0 : i32
    %c0_i32_1 = arith.constant 0 : i32
    return %c0_i32, %c0_i32_0 : i32, i32
  }
  func.func @transform_5(%arg0: i32) -> (i32, i32) {
    %c0_i32 = arith.constant 0 : i32
    %c0_i32_0 = arith.constant 0 : i32
    return %arg0, %c0_i32 : i32, i32
  }
}

</mosaic_0001>

<bundles_post_ra>
// kernel: tpu_custom_call.1
= control target key start
LH: loop header
LB: loop body
LE: loop exit
PB: predicated region body
PF: predicated region fallthrough
CT: control target
= control target key end

     0   :  { %vm37_vm0 = vcmask 1045504   ;;  %v240_v0 = vmov 0.0   ;;  %vm241_vm1 = vmmov 0   ;;  %vm33_vm2 = vcmask 179200   ;;  %s296_s1 = inlined_call_operand.vmem [shape: f32[22,5], index: 1, kind: input, shape index: {}]   ;;  %s297_s0 = inlined_call_operand.vmem [shape: f32[8,22], index: 0, kind: input, shape index: {}]   ;;  %s298_s3 = inlined_call_operand.vmem [shape: f32[5,2], index: 3, kind: input, shape index: {}]   ;;  %s299_s2 = inlined_call_operand.vmem [shape: f32[1,5], index: 2, kind: input, shape index: {}]   ;;  %s300_s4 = inlined_call_operand.vmem [shape: f32[1,2], index: 4, kind: input, shape index: {}]   ;;  %s301_s5 = inlined_call_operand.vmem [shape: f32[8,2], index: 5, kind: output, shape index: {}]  }
   0x1   :  { %220 = vmatprep.subr.mxu0 %v240_v0  ;;  %v22_v1 = vld [vmem:[%s296_s1 + $0x10] sm:$0x3f]  ;;  %v21_v2 = vld [vmem:[%s296_s1 + $0x8] sm:$0xff]  ;;  %226 = vmatprep.mubr.msk.f32.mxu0 %vm241_vm1, %v240_v0  ;;  %v20_v3 = vld [vmem:[%s296_s1] sm:$0xff]  ;;  %vm127_vm3 = vcmask 1044480   ;;  %vm123_vm4 = vcmask 39936  }
   0x2   :  { %221 = vmatpush3.msk.msra.mxu0 %vm37_vm0, %v22_v1  ;;  %229 = vmatprep.subr.mxu1 %v240_v0  ;;  %v26_v4 = vld [vmem:[%s297_s0] sm:$0xff]  ;;  %vm201_vm5 = vcmask 15360  }
   0x3   :  { %222 = vmatprep.subr.mxu0 %v240_v0  ;;  %231 = vmatprep.mubr.msk.f32.mxu1 %vm241_vm1, %v240_v0  ;;  %v24_v5 = vld [vmem:[%s298_s3] sm:$0x1f] }
   0x4   :  { %223 = vmatpush3.msra.mxu0 %v21_v2  ;;  %230 = vmatpush3.msk.msra.mxu1 %vm127_vm3, %v24_v5  ;;  %v207_v6 = vld [vmem:[%s299_s2] ss:$0 sm:$0xff] }
   0x5   :  { %224 = vmatprep.subr.mxu0 %v240_v0  ;;  %v211_v14 = vld [vmem:[%s300_s4] ss:$0 sm:$0xff] }
   0x6   :  { %225 = vmatpush3.msra.mxu0 %v20_v3 }
   0x7   :  { %227 = vmatmul.mubr.msk.f32.vlgmr.msra.gmra.mxu0 %vm33_vm2, %v26_v4 }
  0xc7   :  { %v107_v7 = vpop.f32.mrf.mxu0 }
  0xc8   :  { %v108_v8 = vadd.f32 %v207_v6, %v107_v7 }
  0xc9   :  { %v228_v9 = vpop.f32.mrf.mxu0 }
  0xca   :  { %v210_v10 = vmul.f32 -1.442695, %v108_v8 }
  0xcc   :  { %236 = vpow2.f32 %v210_v10 }
  0xd9   :  { %v237_v11 = vpop.eup %236 }
  0xda   :  { %v114_v12 = vadd.f32 1.0, %v237_v11 }
  0xdc   :  { %238 = vrcp.f32 %v114_v12 }
  0xe9   :  { %v239_v13 = vpop.eup %238 }
  0xea   :  { %232 = vmatmul.mubr.msk.f32.vlgmr.msra.gmra.mxu1 %vm123_vm4, %v239_v13 }
 0x1aa   :  { %v197_v15 = vpop.f32.mrf.mxu1 }
 0x1ab   :  { %v198_v16 = vadd.f32 %v211_v14, %v197_v15 }
 0x1ac   :  { %v233_v17 = vpop.f32.mrf.mxu1 }
 0x1ad   :  { %202 = vst.msk [vmem:[%s301_s5] sm:$0xff] %vm201_vm5, %v198_v16 }

</bundles_post_ra>
